<compile_context>
chip_gen: v7x
topology: tpu7x:2x2x1
jax: 0.10.0
libtpu: 0.0.40
codegen_flags: <defaults>
</compile_context>

<pallas_src>
import math

import jax
import jax.numpy as jnp
from jax.experimental import pallas as pl
from jax.experimental.pallas import tpu as pltpu

LANE = 128


def _physical_vmem_bytes():
    try:
        info = pltpu.get_tpu_info()
        v = int(getattr(info, "vmem_capacity_bytes", 0))
        if v > 0:
            return v
    except Exception:
        pass
    return 64 * 1024 * 1024  # conservative default = v7x (64 MiB per TensorCore)


def _choose_blocks(outer, inner, per_col_bytes, budget):
    """Pick (B_outer, T_inner) so B*T*per_col_bytes <= budget (best effort)."""
    full_row = inner * per_col_bytes
    if full_row <= budget:
        T = inner                                    # contiguous (c_i, inner) slabs
        B = max(1, min(outer, budget // max(1, full_row)))
        # Keep >= 2 grid steps when possible so both v7x TensorCores get work.
        if B == outer and outer > 1:
            B = pl.cdiv(outer, 2)
    else:
        B = 1
        if inner <= LANE:
            T = inner                                # tiny trailing dim: full-dim block
        else:
            T = (budget // max(1, per_col_bytes)) // LANE * LANE
            T = max(LANE, min(T, pl.cdiv(inner, LANE) * LANE))
            if T >= inner:
                T = inner
    return int(B), int(T)


def _make_kernel(fused):
    if fused:
        # One full, lane- and sublane-aligned block store; the in-register pack lands on
        # VPU/XLU slots that are idle in this HBM-bound copy.
        def kernel(*refs):
            out_ref = refs[-1]
            parts = [r[...].astype(out_ref.dtype) for r in refs[:-1]]
            out_ref[...] = parts[0] if len(parts) == 1 else jnp.concatenate(parts, axis=1)
    else:
        # Fallback: per-input partial-range stores (may be sublane-masked but always lowers).
        def kernel(*refs):
            out_ref = refs[-1]
            off = 0
            for r in refs[:-1]:
                c = r.shape[1]
                out_ref[:, off:off + c, :] = r[...].astype(out_ref.dtype)
                off += c
    return kernel


def concat(tensors, dimension=1):
    """Pallas TPU equivalent of Concat.forward(x) == torch.cat(x, dim=dimension)."""
    n = len(tensors)
    assert n >= 1, "need at least one tensor"
    if n == 1:
        return tensors[0]

    shapes = [tuple(t.shape) for t in tensors]
    rank = len(shapes[0])
    d = dimension % rank
    for s in shapes[1:]:
        assert len(s) == rank, "rank mismatch"
        for ax in range(rank):
            if ax != d:
                assert s[ax] == shapes[0][ax], "non-concat dims must match"

    # TODO(synk): jnp.result_type promotion may differ from torch.cat for exotic
    # bool/int/float mixes; typical usage (all-same-dtype) is unaffected.
    out_dtype = jnp.result_type(*[t.dtype for t in tensors])
    channels = [int(s[d]) for s in shapes]
    c_total = sum(channels)
    outer = int(math.prod(shapes[0][:d]))
    inner = int(math.prod(shapes[0][d + 1:]))
    out_shape_full = tuple(shapes[0][:d]) + (c_total,) + tuple(shapes[0][d + 1:])

    # Degenerate shapes: nothing to move.
    if outer == 0 or inner == 0 or c_total == 0:
        return jnp.zeros(out_shape_full, out_dtype)

    # Drop zero-width operands; free row-major collapses -> (outer, C_i, inner).
    ins3d, eff_channels = [], []
    for t, c in zip(tensors, channels):
        if c > 0:
            ins3d.append(t.reshape(outer, c, inner))
            eff_channels.append(c)

    out_isz = jnp.dtype(out_dtype).itemsize
    # Per (outer, inner) column: input blocks in their NATIVE dtype + output block.
    per_col_bytes = sum(c * jnp.dtype(t.dtype).itemsize
                        for t, c in zip(ins3d, eff_channels))
    per_col_bytes += c_total * out_isz

    phys = _physical_vmem_bytes()
    budget = max(1 << 20, phys // 6)          # single-buffered bytes per grid step
    B, T = _choose_blocks(outer, inner, per_col_bytes, budget)
    step_bytes = B * T * per_col_bytes

    n_ob = pl.cdiv(outer, B)
    n_it = pl.cdiv(inner, T)
    if n_ob >= n_it:                          # larger axis first -> balanced megacore split
        grid = (n_ob, n_it)
        idx = lambda b, t: (b, 0, t)
    else:
        grid = (n_it, n_ob)
        idx = lambda t, b: (b, 0, t)

    # Second-minor block dim equals the full array dim (any C_i legal); inner tile is
    # either the full dim or a multiple of 128 (ragged tail handled by Pallas).
    in_specs = [pl.BlockSpec((B, c, T), idx) for c in eff_channels]
    out_spec = pl.BlockSpec((B, c_total, T), idx)

    total_bytes = int(sum(t.size * t.dtype.itemsize for t in ins3d)
                      + outer * c_total * inner * out_isz)
    vmem_limit = int(min(max(2 * step_bytes + (4 << 20), 32 << 20), phys * 7 // 8))

    def _run(fused):
        out3d = pl.pallas_call(
            _make_kernel(fused),
            out_shape=jax.ShapeDtypeStruct((outer, c_total, inner), out_dtype),
            grid_spec=pltpu.PrefetchScalarGridSpec(
                num_scalar_prefetch=0,
                grid=grid,
                in_specs=in_specs,
                out_specs=out_spec,
            ),
            compiler_params=pltpu.CompilerParams(
                dimension_semantics=("parallel", "parallel"),
                vmem_limit_bytes=vmem_limit,
            ),
            cost_estimate=pl.CostEstimate(
                flops=0, transcendentals=0, bytes_accessed=total_bytes),
        )(*ins3d)
        return jax.block_until_ready(out3d)

    try:
        out3d = _run(fused=True)
    except Exception:
        out3d = _run(fused=False)

    return out3d.reshape(out_shape_full)


if __name__ == "__main__":
    key = jax.random.PRNGKey(0)
    k1, k2, k3, k4, k5 = jax.random.split(key, 5)

    # Case 1: NCHW activations, concat along channels (dim=1), sublane-unaligned counts.
    xs = [
        jax.random.normal(k1, (2, 4, 16, 16), jnp.float32),
        jax.random.normal(k2, (2, 6, 16, 16), jnp.float32),
        jax.random.normal(k3, (2, 2, 16, 16), jnp.float32),
    ]
    out = jax.block_until_ready(concat(xs, dimension=1))
    ref = jnp.concatenate(xs, axis=1)
    assert out.shape == ref.shape == (2, 12, 16, 16)
    assert out.dtype == ref.dtype
    assert jnp.array_equal(out, ref), "mismatch vs jnp.concatenate reference (case 1)"

    # Case 2: mixed dtypes (bf16 + f32) -> in-register cast to the promoted dtype.
    ys = [
        jax.random.normal(k4, (2, 3, 8, 32), jnp.bfloat16),
        jax.random.normal(k5, (2, 5, 8, 32), jnp.float32),
    ]
    out2 = jax.block_until_ready(concat(ys, dimension=1))
    ref2 = jnp.concatenate([y.astype(jnp.float32) for y in ys], axis=1)
    assert out2.shape == ref2.shape == (2, 8, 8, 32)
    assert out2.dtype == jnp.float32
    assert jnp.array_equal(out2, ref2), "mismatch vs jnp.concatenate reference (case 2)"

    print("KERNEL_OK")
</pallas_src>

<mosaic_0001>
module attributes {stable_mosaic.version = 11 : i64} {
  func.func @kernel(%arg0: i32, %arg1: i32, %arg2: memref<1x4x256xf32, #tpu.memory_space<vmem>>, %arg3: memref<1x6x256xf32, #tpu.memory_space<vmem>>, %arg4: memref<1x2x256xf32, #tpu.memory_space<vmem>>, %arg5: memref<1x12x256xf32, #tpu.memory_space<vmem>>) attributes {dimension_semantics = [#tpu.dimension_semantics<parallel>, #tpu.dimension_semantics<parallel>], iteration_bounds = array<i64: 2, 1>, scalar_prefetch = 0 : i64, scratch_operands = 0 : i64, tpu.core_type = #tpu.core_type<tc>, window_params = [{transform_indices = @transform_0, window_bounds = array<i64: 1, 4, 256>}, {transform_indices = @transform_1, window_bounds = array<i64: 1, 6, 256>}, {transform_indices = @transform_2, window_bounds = array<i64: 1, 2, 256>}, {transform_indices = @transform_3, window_bounds = array<i64: 1, 12, 256>}]} {
    %c0 = arith.constant 0 : index
    %c0_0 = arith.constant 0 : index
    %c0_1 = arith.constant 0 : index
    %0 = vector.load %arg2[%c0, %c0_0, %c0_1] : memref<1x4x256xf32, #tpu.memory_space<vmem>>, vector<1x4x256xf32>
    %c0_2 = arith.constant 0 : index
    %c0_3 = arith.constant 0 : index
    %c0_4 = arith.constant 0 : index
    %1 = vector.load %arg3[%c0_2, %c0_3, %c0_4] : memref<1x6x256xf32, #tpu.memory_space<vmem>>, vector<1x6x256xf32>
    %c0_5 = arith.constant 0 : index
    %c0_6 = arith.constant 0 : index
    %c0_7 = arith.constant 0 : index
    %2 = vector.load %arg4[%c0_5, %c0_6, %c0_7] : memref<1x2x256xf32, #tpu.memory_space<vmem>>, vector<1x2x256xf32>
    %3 = tpu.concatenate %0, %1, %2 in 1 : vector<1x4x256xf32>, vector<1x6x256xf32>, vector<1x2x256xf32> -> vector<1x12x256xf32>
    %c0_8 = arith.constant 0 : index
    %c0_9 = arith.constant 0 : index
    %c0_10 = arith.constant 0 : index
    %4 = vector.load %arg5[%c0_8, %c0_9, %c0_10] : memref<1x12x256xf32, #tpu.memory_space<vmem>>, vector<1x12x256xf32>
    tpu.vector_store %arg5[%c0_8, %c0_9, %c0_10], %3 {strides = array<i32>} : memref<1x12x256xf32, #tpu.memory_space<vmem>>, vector<1x12x256xf32>,
    return
  }
  func.func @transform_0(%arg0: i32, %arg1: i32) -> (i32, i32, i32) {
    %c0_i32 = arith.constant 0 : i32
    %c0_i32_0 = arith.constant 0 : i32
    return %arg0, %c0_i32, %arg1 : i32, i32, i32
  }
  func.func @transform_1(%arg0: i32, %arg1: i32) -> (i32, i32, i32) {
    %c0_i32 = arith.constant 0 : i32
    %c0_i32_0 = arith.constant 0 : i32
    return %arg0, %c0_i32, %arg1 : i32, i32, i32
  }
  func.func @transform_2(%arg0: i32, %arg1: i32) -> (i32, i32, i32) {
    %c0_i32 = arith.constant 0 : i32
    %c0_i32_0 = arith.constant 0 : i32
    return %arg0, %c0_i32, %arg1 : i32, i32, i32
  }
  func.func @transform_3(%arg0: i32, %arg1: i32) -> (i32, i32, i32) {
    %c0_i32 = arith.constant 0 : i32
    %c0_i32_0 = arith.constant 0 : i32
    return %arg0, %c0_i32, %arg1 : i32, i32, i32
  }
}

module attributes {stable_mosaic.version = 11 : i64} {
  func.func @kernel(%arg0: i32, %arg1: i32, %arg2: memref<1x4x256xf32, #tpu.memory_space<vmem>>, %arg3: memref<1x6x256xf32, #tpu.memory_space<vmem>>, %arg4: memref<1x2x256xf32, #tpu.memory_space<vmem>>, %arg5: memref<1x12x256xf32, #tpu.memory_space<vmem>>) attributes {dimension_semantics = [#tpu.dimension_semantics<parallel>, #tpu.dimension_semantics<parallel>], iteration_bounds = array<i64: 2, 1>, scalar_prefetch = 0 : i64, scratch_operands = 0 : i64, tpu.core_type = #tpu.core_type<tc>, window_params = [{transform_indices = @transform_0, window_bounds = array<i64: 1, 4, 256>}, {transform_indices = @transform_1, window_bounds = array<i64: 1, 6, 256>}, {transform_indices = @transform_2, window_bounds = array<i64: 1, 2, 256>}, {transform_indices = @transform_3, window_bounds = array<i64: 1, 12, 256>}]} {
    %c0 = arith.constant 0 : index
    %c0_0 = arith.constant 0 : index
    %c0_1 = arith.constant 0 : index
    %0 = vector.load %arg2[%c0, %c0_0, %c0_1] : memref<1x4x256xf32, #tpu.memory_space<vmem>>, vector<1x4x256xf32>
    %c0_2 = arith.constant 0 : index
    %c0_3 = arith.constant 0 : index
    %c0_4 = arith.constant 0 : index
    %1 = vector.load %arg5[%c0_2, %c0_3, %c0_4] : memref<1x12x256xf32, #tpu.memory_space<vmem>>, vector<1x4x256xf32>
    tpu.vector_store %arg5[%c0_2, %c0_3, %c0_4], %0 {strides = array<i32>} : memref<1x12x256xf32, #tpu.memory_space<vmem>>, vector<1x4x256xf32>,
    %c0_5 = arith.constant 0 : index
    %c0_6 = arith.constant 0 : index
    %c0_7 = arith.constant 0 : index
    %2 = vector.load %arg3[%c0_5, %c0_6, %c0_7] : memref<1x6x256xf32, #tpu.memory_space<vmem>>, vector<1x6x256xf32>
    %c0_8 = arith.constant 0 : index
    %c4 = arith.constant 4 : index
    %c0_9 = arith.constant 0 : index
    %3 = vector.load %arg5[%c0_8, %c4, %c0_9] : memref<1x12x256xf32, #tpu.memory_space<vmem>>, vector<1x6x256xf32>
    tpu.vector_store %arg5[%c0_8, %c4, %c0_9], %2 {strides = array<i32>} : memref<1x12x256xf32, #tpu.memory_space<vmem>>, vector<1x6x256xf32>,
    %c0_10 = arith.constant 0 : index
    %c0_11 = arith.constant 0 : index
    %c0_12 = arith.constant 0 : index
    %4 = vector.load %arg4[%c0_10, %c0_11, %c0_12] : memref<1x2x256xf32, #tpu.memory_space<vmem>>, vector<1x2x256xf32>
    %c0_13 = arith.constant 0 : index
    %c10 = arith.constant 10 : index
    %c0_14 = arith.constant 0 : index
    %5 = vector.load %arg5[%c0_13, %c10, %c0_14] : memref<1x12x256xf32, #tpu.memory_space<vmem>>, vector<1x2x256xf32>
    tpu.vector_store %arg5[%c0_13, %c10, %c0_14], %4 {strides = array<i32>} : memref<1x12x256xf32, #tpu.memory_space<vmem>>, vector<1x2x256xf32>,
    return
  }
  func.func @transform_0(%arg0: i32, %arg1: i32) -> (i32, i32, i32) {
    %c0_i32 = arith.constant 0 : i32
    %c0_i32_0 = arith.constant 0 : i32
    return %arg0, %c0_i32, %arg1 : i32, i32, i32
  }
  func.func @transform_1(%arg0: i32, %arg1: i32) -> (i32, i32, i32) {
    %c0_i32 = arith.constant 0 : i32
    %c0_i32_0 = arith.constant 0 : i32
    return %arg0, %c0_i32, %arg1 : i32, i32, i32
  }
  func.func @transform_2(%arg0: i32, %arg1: i32) -> (i32, i32, i32) {
    %c0_i32 = arith.constant 0 : i32
    %c0_i32_0 = arith.constant 0 : i32
    return %arg0, %c0_i32, %arg1 : i32, i32, i32
  }
  func.func @transform_3(%arg0: i32, %arg1: i32) -> (i32, i32, i32) {
    %c0_i32 = arith.constant 0 : i32
    %c0_i32_0 = arith.constant 0 : i32
    return %arg0, %c0_i32, %arg1 : i32, i32, i32
  }
}

</mosaic_0001>

<bundles_post_ra>
// kernel: tpu_custom_call.1
= control target key start
LH: loop header
LB: loop body
LE: loop exit
PB: predicated region body
PF: predicated region fallthrough
CT: control target
= control target key end

     0   :  { %s531_s12 = smov 0   ;;  %s533_s13 = smov 0   ;;  %s570_s0 = inlined_call_operand.vmem [shape: f32[2,4,256], index: 0, kind: input, shape index: {}]   ;;  %s571_s1 = inlined_call_operand.vmem [shape: f32[2,6,256], index: 1, kind: input, shape index: {}]   ;;  %s572_s2 = inlined_call_operand.vmem [shape: f32[2,2,256], index: 2, kind: input, shape index: {}]   ;;  %s573_s3 = inlined_call_operand.vmem [shape: f32[2,12,256], index: 3, kind: output, shape index: {}]  }
   0x1   :  { %s535_s14 = smov 0  }
   0x2 LB: > { %s25_s15 = sadd.s32 1, %s504_s13  ;;  %p444_p0 = scmp.ge.s32.totalorder %s508_s14, 1  ;;  %s508_s14 = sphi %s535_s14, %s13_s14   ;;  %s504_s13 = sphi %s533_s13, %s575_s13   ;;  %s500_s12 = sphi %s531_s12, %s574_s12  }
   0x3   : > { %p27_p1 = scmp.ge.s32.totalorder %s25_s15, 2  ;;  %p192_p2 = scmp.lt.s32.totalorder %s508_s14, 3 }
   0x5   : > { %s577_s15 = smov (%p27_p1, %s25_s15), 0  ;;  %p193_p3 = pnand %p444_p0, %p192_p2 }
   0x6   : > { %p243_p4 = scmp.lt.s32.totalorder (!%p193_p3), %s500_s12, 1  ;;  %v300_v0 = vlaneseq (!%p193_p3)  ;;  %v510_v1 = vmov (!%p193_p3), 1983009808   ;;  %vm307_vm0 = vcmask (!%p193_p3), 1043456   ;;  %vm310_vm1 = vcmask (!%p193_p3), 1041408  }
   0x7   : > { %196 = sbr.rel (%p193_p3) target bundleno = 26 (0x1a), region = 32  ;;  %v298_v2 = vunpack.c.l.s4 (!%p193_p3), %v510_v1 }
   0x8   : > { %v301_v4 = vshrl.u32 (!%p193_p3), %v300_v0, 7 }
   0x9   : > { %v299_v3 = vunpack.c.0.s8 (!%p193_p3), %v298_v2 }
   0xb   : > { %v302_v11 = vsub.s32 (!%p193_p3), %v299_v3, %v301_v4 }
   0xe   : > { %s579_s12 = smov (!%p243_p4, %s500_s12), 1 }
   0xf   : > { %s455_s16 = sshll.u32 %s579_s12, 3  ;;  %s456_s17 = sshll.u32 %s579_s12, 4 }
  0x10   : > { %s250_s20 = scalar_lea.vmem %s570_s0, %s455_s16  ;;  %s260_s23 = scalar_lea.vmem %s571_s1, %s456_s17 }
  0x11   : > { %s458_s24 = sshll.u32 %s579_s12, 5  ;;  %v282_v5 = vld [vmem:[%s250_s20] sm:$0xff]  ;;  %v284_v7 = vld [vmem:[%s260_s23 + $0x8] sm:$0x3f]  ;;  %s457_s28 = sshll.u32 %s579_s12, 2 }
  0x12   : > { %v283_v6 = vld [vmem:[%s260_s23] sm:$0x3f]  ;;  %s280_s27 = scalar_lea.vmem %s573_s3, %s458_s24  ;;  %v287_v8 = vcombine.high %v282_v5, %v282_v5  ;;  %v292_v10 = vrot.slane %v284_v7, 4  ;;  %s270_s4 = scalar_lea.vmem %s572_s2, %s457_s28 }
  0x13   : > { %v291_v9 = vrot.slane %v283_v6, 4  ;;  %v485_v14 = vld [vmem:[%s270_s4] ss:$0 sps:$4 sm:$0xff]  }
  0x14   : > { %v309_v13 = vsel %vm307_vm0, %v287_v8, %v292_v10  ;;  %v303_v15 = vrot.slane %v485_v14, %v302_v11 }
  0x15   : > { %v308_v12 = vsel %vm307_vm0, %v282_v5, %v291_v9  ;;  %314 = vst [vmem:[%s280_s27 + $0x8] sm:$0xff] %v309_v13 }
  0x16   : > { %313 = vst [vmem:[%s280_s27] sm:$0xff] %v308_v12  ;;  %v311_v16 = vsel %vm310_vm1, %v291_v9, %v303_v15  ;;  %v304_v17 = vcombine.high %v303_v15, %v303_v15 }
  0x17   : > { %315 = vst [vmem:[%s280_s27 + $0x10] sm:$0xf] %v311_v16 }
  0x18   : > { %v312_v18 = vsel %vm310_vm1, %v292_v10, %v304_v17 }
  0x19   : > { %316 = vst [vmem:[%s280_s27 + $0x18] sm:$0xf] %v312_v18 }
  0x1a PF: > { %s13_s14 = sadd.s32 1, %s508_s14   ;;  %s574_s12 = smov %s504_s13 }
  0x1b   : > { %p10_p5 = scmp.ge.s32.totalorder %s13_s14, 4   ;;  %s575_s13 = smov %s577_s15 }
  0x1d   :  { %12 = sbr.rel (!%p10_p5) target bundleno = 2 (0x2), region = 68 }

// kernel: tpu_custom_call.1
= control target key start
LH: loop header
LB: loop body
LE: loop exit
PB: predicated region body
PF: predicated region fallthrough
CT: control target
= control target key end

     0   :  { %s530_s12 = smov 0   ;;  %s532_s13 = smov 0   ;;  %s569_s0 = inlined_call_operand.vmem [shape: f32[2,4,256], index: 0, kind: input, shape index: {}]   ;;  %s570_s1 = inlined_call_operand.vmem [shape: f32[2,6,256], index: 1, kind: input, shape index: {}]   ;;  %s571_s2 = inlined_call_operand.vmem [shape: f32[2,2,256], index: 2, kind: input, shape index: {}]   ;;  %s572_s3 = inlined_call_operand.vmem [shape: f32[2,12,256], index: 3, kind: output, shape index: {}]  }
   0x1   :  { %s534_s14 = smov 0  }
   0x2 LB: > { %s25_s15 = sadd.s32 1, %s503_s13  ;;  %p442_p0 = scmp.ge.s32.totalorder %s507_s14, 1  ;;  %s507_s14 = sphi %s534_s14, %s13_s14   ;;  %s503_s13 = sphi %s532_s13, %s574_s13   ;;  %s499_s12 = sphi %s530_s12, %s573_s12  }
   0x3   : > { %p27_p1 = scmp.ge.s32.totalorder %s25_s15, 2  ;;  %p192_p2 = scmp.lt.s32.totalorder %s507_s14, 3 }
   0x5   : > { %s576_s15 = smov (%p27_p1, %s25_s15), 0  ;;  %p193_p3 = pnand %p442_p0, %p192_p2 }
   0x6   : > { %p243_p4 = scmp.lt.s32.totalorder (!%p193_p3), %s499_s12, 1  ;;  %v306_v0 = vlaneseq (!%p193_p3)  ;;  %v509_v1 = vmov (!%p193_p3), 1983009808  }
   0x7   : > { %196 = sbr.rel (%p193_p3) target bundleno = 26 (0x1a), region = 32  ;;  %v304_v2 = vunpack.c.l.s4 (!%p193_p3), %v509_v1 }
   0x8   : > { %v307_v4 = vshrl.u32 (!%p193_p3), %v306_v0, 7 }
   0x9   : > { %v305_v3 = vunpack.c.0.s8 (!%p193_p3), %v304_v2 }
   0xb   : > { %v308_v7 = vsub.s32 (!%p193_p3), %v305_v3, %v307_v4 }
   0xe   : > { %s578_s12 = smov (!%p243_p4, %s499_s12), 1 }
   0xf   : > { %s454_s16 = sshll.u32 %s578_s12, 3  ;;  %s457_s17 = sshll.u32 %s578_s12, 5 }
  0x10   : > { %s250_s20 = scalar_lea.vmem %s569_s0, %s454_s16  ;;  %s280_s23 = scalar_lea.vmem %s572_s3, %s457_s17 }
  0x11   : > { %v282_v5 = vld [vmem:[%s250_s20] sm:$0xff]  ;;  %s455_s24 = sshll.u32 %s578_s12, 4  ;;  %s456_s25 = sshll.u32 %s578_s12, 2 }
  0x12   : > { %286 = vst [vmem:[%s280_s23] sm:$0xf] %v282_v5  ;;  %v284_v6 = vcombine.high %v282_v5, %v282_v5  ;;  %s260_s28 = scalar_lea.vmem %s570_s1, %s455_s24  ;;  %s270_s4 = scalar_lea.vmem %s571_s2, %s456_s25 }
  0x13   : > { %v288_v8 = vld [vmem:[%s260_s28] sm:$0x3f]  ;;  %v289_v9 = vld [vmem:[%s260_s28 + $0x8] sm:$0x3f] }
  0x14   : > { %287 = vst [vmem:[%s280_s23 + $0x8] sm:$0xf] %v284_v6  ;;  %v292_v10 = vrot.slane %v288_v8, 4  ;;  %v293_v11 = vrot.slane %v289_v9, 4  ;;  %v484_v12 = vld [vmem:[%s270_s4] ss:$0 sps:$4 sm:$0xff]  }
  0x15   : > { %451 = vst.sshfl [vmem:[%s280_s23 + $0x10] sm:$0x30 pattern:$0x76325410] %v484_v12  ;;  %v309_v13 = vrot.slane %v484_v12, %v308_v7 }
  0x16   : > { %296 = vst [vmem:[%s280_s23 + $0x10] ss:$-12 sps:$4 sm:$0xf3] %v292_v10   ;;  %297 = vst [vmem:[%s280_s23 + $0x18] ss:$-12 sps:$4 sm:$0xf3] %v293_v11  }
  0x17   : > { %v310_v14 = vcombine.high %v309_v13, %v309_v13 }
  0x19   : > { %314 = vst [vmem:[%s280_s23 + $0x18] sm:$0xc] %v310_v14 }
  0x1a PF: > { %s13_s14 = sadd.s32 1, %s507_s14   ;;  %s573_s12 = smov %s503_s13 }
  0x1b   : > { %p10_p5 = scmp.ge.s32.totalorder %s13_s14, 4   ;;  %s574_s13 = smov %s576_s15 }
  0x1d   :  { %12 = sbr.rel (!%p10_p5) target bundleno = 2 (0x2), region = 68 }

</bundles_post_ra>
